<compile_context>
chip_gen: v7x
topology: tpu7x:2x2x1
jax: 0.10.0
libtpu: 0.0.40
codegen_flags: <defaults>
</compile_context>

<pallas_src>
import jax
import jax.numpy as jnp
from jax import lax
from jax.experimental import pallas as pl
from jax.experimental.pallas import tpu as pltpu

_H0, _H1 = 130, 75          # hidden sizes from the PyTorch module
_LANE = 128
_MAX_TILE = 2048            # max lanes streamed per grid step (w0 K / w2 N)


def _round_up(n, m):
    return ((n + m - 1) // m) * m


def _pick_tiling(w_size):
    """Pick (tile, wp): tile is a multiple of 128, <= _MAX_TILE; wp is the
    zero-padded flattened size, an exact multiple of tile (waste < n*128)."""
    wp128 = _round_up(max(int(w_size), 1), _LANE)
    n_tiles = -(-wp128 // _MAX_TILE)
    tile = _round_up(-(-wp128 // n_tiles), _LANE)
    return tile, n_tiles * tile


# ---------------------------------------------------------------------------
# Kernels
# ---------------------------------------------------------------------------

def _layer01_kernel(x_ref, w0_ref, b0_ref, w1_ref, b1_ref, y1_ref, acc_ref):
    """Streams w0 over its K(=Wp) axis; y0 accumulates in a (1,130) f32 VMEM
    scratch; the tiny layer-1 (130->75) matmul is fused into the last step."""
    k = pl.program_id(0)

    @pl.when(k == 0)
    def _init():
        acc_ref[...] = jnp.zeros_like(acc_ref)

    # (1, tile) . (130, tile) contracting the tile axes -> (1, 130)
    acc_ref[...] += lax.dot_general(
        x_ref[...].astype(jnp.bfloat16), w0_ref[...],
        dimension_numbers=(((1,), (1,)), ((), ())),
        preferred_element_type=jnp.float32)

    @pl.when(k == pl.num_programs(0) - 1)
    def _finalize():
        y0 = jnp.maximum(acc_ref[...] + b0_ref[...], 0.0)            # (1, 130)
        y1 = lax.dot_general(
            y0.astype(jnp.bfloat16), w1_ref[...],
            dimension_numbers=(((1,), (1,)), ((), ())),
            preferred_element_type=jnp.float32)                      # (1, 75)
        y1_ref[...] = jnp.maximum(y1 + b1_ref[...], 0.0)


def _layer2_kernel(y1_ref, w2t_ref, b2_ref, o_ref):
    """Streams w2 over its N(=Wp) axis; each step writes one lane-dense
    (1, tile) output block directly in the caller's dtype."""
    y2 = lax.dot_general(
        y1_ref[...].astype(jnp.bfloat16), w2t_ref[...],
        dimension_numbers=(((1,), (0,)), ((), ())),
        preferred_element_type=jnp.float32)                          # (1, tile)
    y2 = jnp.maximum(y2 + b2_ref[...].astype(jnp.float32), 0.0)
    o_ref[...] = y2.astype(o_ref.dtype)


# ---------------------------------------------------------------------------
# Parameters
# ---------------------------------------------------------------------------

def init_aw_params(key, w_size, dtype=jnp.float32):
    """Deterministic init matching nn.Linear parameter shapes (PyTorch layout).

    fc0.weight: (130, w_size), fc0.bias: (130,)
    fc1.weight: (75, 130),     fc1.bias: (75,)
    fc2.weight: (w_size, 75),  fc2.bias: (w_size,)
    """
    ks = jax.random.split(key, 6)

    def lin(kw, kb, fan_out, fan_in):
        bound = 1.0 / jnp.sqrt(jnp.asarray(fan_in, dtype))
        w = jax.random.uniform(kw, (fan_out, fan_in), dtype, -bound, bound)
        b = jax.random.uniform(kb, (fan_out,), dtype, -bound, bound)
        return w, b

    w0, b0 = lin(ks[0], ks[1], _H0, w_size)
    w1, b1 = lin(ks[2], ks[3], _H1, _H0)
    w2, b2 = lin(ks[4], ks[5], w_size, _H1)
    return (w0, b0, w1, b1, w2, b2)


def prepare_aw_params(params, w_size):
    """One-time prep: bf16 weights in streaming-friendly orientations; only the
    flattened w_size axis is zero-padded (hidden dims stay 130 / 75)."""
    w0, b0, w1, b1, w2, b2 = params
    _, wp = _pick_tiling(w_size)
    pad_w = wp - w_size

    w0p = jnp.pad(w0, ((0, 0), (0, pad_w))).astype(jnp.bfloat16)     # (130, Wp)
    b0p = b0.reshape(1, _H0).astype(jnp.float32)                     # (1, 130)
    w1p = w1.astype(jnp.bfloat16)                                    # (75, 130)
    b1p = b1.reshape(1, _H1).astype(jnp.float32)                     # (1, 75)
    w2t = jnp.pad(w2.T, ((0, 0), (0, pad_w))).astype(jnp.bfloat16)   # (75, Wp)
    b2p = jnp.pad(b2, (0, pad_w)).reshape(1, wp).astype(jnp.bfloat16)  # (1, Wp)
    return (w0p, b0p, w1p, b1p, w2t, b2p)


# ---------------------------------------------------------------------------
# Forward
# ---------------------------------------------------------------------------

@jax.jit
def _aw_forward_impl(x, w0p, b0p, w1p, b1p, w2t, b2p):
    shape = x.shape
    w_size = x.size
    tile, wp = _pick_tiling(w_size)
    assert w0p.shape == (_H0, wp) and w2t.shape == (_H1, wp), \
        "prepared params do not match x.size"
    n_tiles = wp // tile

    x_row = jnp.pad(x.reshape(1, -1), ((0, 0), (0, wp - w_size)))

    # ---- layers 0 + 1: stream w0 over K, accumulate, fuse 130->75 ----------
    y1 = pl.pallas_call(
        _layer01_kernel,
        out_shape=jax.ShapeDtypeStruct((1, _H1), jnp.float32),
        grid=(n_tiles,),
        in_specs=[
            pl.BlockSpec((1, tile), lambda k: (0, k)),        # x
            pl.BlockSpec((_H0, tile), lambda k: (0, k)),      # w0
            pl.BlockSpec((1, _H0), lambda k: (0, 0)),         # b0
            pl.BlockSpec((_H1, _H0), lambda k: (0, 0)),       # w1
            pl.BlockSpec((1, _H1), lambda k: (0, 0)),         # b1
        ],
        out_specs=pl.BlockSpec((1, _H1), lambda k: (0, 0)),
        scratch_shapes=[pltpu.VMEM((1, _H0), jnp.float32)],
        compiler_params=pltpu.CompilerParams(
            dimension_semantics=("arbitrary",)),
    )(x_row, w0p, b0p, w1p, b1p)

    # ---- layer 2: stream w2 over N; independent output tiles ("parallel") --
    out_row = pl.pallas_call(
        _layer2_kernel,
        out_shape=jax.ShapeDtypeStruct((1, wp), x.dtype),
        grid=(n_tiles,),
        in_specs=[
            pl.BlockSpec((1, _H1), lambda j: (0, 0)),         # y1
            pl.BlockSpec((_H1, tile), lambda j: (0, j)),      # w2^T
            pl.BlockSpec((1, tile), lambda j: (0, j)),        # b2
        ],
        out_specs=pl.BlockSpec((1, tile), lambda j: (0, j)),
        compiler_params=pltpu.CompilerParams(
            dimension_semantics=("parallel",)),
    )(y1, w2t, b2p)

    return out_row[0, :w_size].reshape(shape)


def aw_forward(x, prepared_params):
    """JAX/Pallas equivalent of Aw.forward(x); prepared_params from
    prepare_aw_params()."""
    return _aw_forward_impl(x, *prepared_params)


# ---------------------------------------------------------------------------
# References
# ---------------------------------------------------------------------------

def _reference_forward(x, params):
    """Pure-f32 reference matching the PyTorch module exactly."""
    w0, b0, w1, b1, w2, b2 = params
    v = x.reshape(-1)
    y0 = jnp.maximum(v @ w0.T + b0, 0.0)
    y1 = jnp.maximum(y0 @ w1.T + b1, 0.0)
    y2 = jnp.maximum(y1 @ w2.T + b2, 0.0)
    return y2.reshape(x.shape)


def _reference_forward_bf16(x, params):
    """Reference mimicking the kernel's bf16 weights/activations (and bf16 b2)
    with f32 accumulation (tight-tolerance check target)."""
    w0, b0, w1, b1, w2, b2 = params
    q = lambda a: a.astype(jnp.bfloat16).astype(jnp.float32)
    v = x.reshape(-1)
    y0 = jnp.maximum(q(v) @ q(w0.T) + b0, 0.0)
    y1 = jnp.maximum(q(y0) @ q(w1.T) + b1, 0.0)
    y2 = jnp.maximum(q(y1) @ q(w2.T) + q(b2), 0.0)
    return y2.reshape(x.shape)


if __name__ == "__main__":
    key = jax.random.PRNGKey(0)
    k_x1, k_p1, k_x2, k_p2 = jax.random.split(key, 4)

    # Case 1: small "W" matrix (l=8, f=4) -> w_size=32; single-tile grid.
    x1 = jax.random.normal(k_x1, (8, 4), dtype=jnp.float32)
    p1 = init_aw_params(k_p1, x1.size)
    out1 = jax.block_until_ready(aw_forward(x1, prepare_aw_params(p1, x1.size)))
    assert out1.shape == x1.shape and out1.dtype == x1.dtype
    assert jnp.allclose(out1, _reference_forward_bf16(x1, p1), atol=2e-3, rtol=2e-3), \
        "case1 mismatch vs bf16-quantized reference"
    assert jnp.allclose(out1, _reference_forward(x1, p1), atol=5e-2, rtol=5e-2), \
        "case1 mismatch vs f32 reference"

    # Case 2: larger "W" (l=48, f=48) -> w_size=2304; exercises the multi-step
    # K accumulation grid of layers 0+1 and the parallel N grid of layer 2.
    x2 = jax.random.normal(k_x2, (48, 48), dtype=jnp.float32)
    p2 = init_aw_params(k_p2, x2.size)
    out2 = jax.block_until_ready(aw_forward(x2, prepare_aw_params(p2, x2.size)))
    assert out2.shape == x2.shape and out2.dtype == x2.dtype
    assert jnp.allclose(out2, _reference_forward_bf16(x2, p2), atol=2e-3, rtol=2e-3), \
        "case2 mismatch vs bf16-quantized reference"
    assert jnp.allclose(out2, _reference_forward(x2, p2), atol=5e-2, rtol=5e-2), \
        "case2 mismatch vs f32 reference"

    print("KERNEL_OK")
</pallas_src>

<mosaic_0001>
module attributes {stable_mosaic.version = 11 : i64} {
  func.func @_layer01_kernel(%arg0: i32, %arg1: memref<1x128xf32, #tpu.memory_space<vmem>>, %arg2: memref<130x128xbf16, #tpu.memory_space<vmem>>, %arg3: memref<1x130xf32, #tpu.memory_space<vmem>>, %arg4: memref<75x130xbf16, #tpu.memory_space<vmem>>, %arg5: memref<1x75xf32, #tpu.memory_space<vmem>>, %arg6: memref<1x75xf32, #tpu.memory_space<vmem>>, %arg7: memref<1x130xf32, #tpu.memory_space<vmem>>) attributes {dimension_semantics = [#tpu.dimension_semantics<arbitrary>], iteration_bounds = array<i64: 1>, scalar_prefetch = 0 : i64, scratch_operands = 1 : i64, tpu.core_type = #tpu.core_type<tc>, window_params = [{transform_indices = @transform_0, window_bounds = array<i64: 1, 128>}, {transform_indices = @transform_1, window_bounds = array<i64: 130, 128>}, {pipeline_mode = #tpu.pipeline_mode<synchronous>, transform_indices = @transform_2, window_bounds = array<i64: 1, 130>}, {pipeline_mode = #tpu.pipeline_mode<synchronous>, transform_indices = @transform_3, window_bounds = array<i64: 75, 130>}, {pipeline_mode = #tpu.pipeline_mode<synchronous>, transform_indices = @transform_4, window_bounds = array<i64: 1, 75>}, {pipeline_mode = #tpu.pipeline_mode<synchronous>, transform_indices = @transform_5, window_bounds = array<i64: 1, 75>}]} {
    %c0_i32 = arith.constant 0 : i32
    %0 = arith.cmpi eq, %arg0, %c0_i32 : i32
    %1 = arith.extui %0 : i1 to i32
    %c0_i32_0 = arith.constant 0 : i32
    %2 = arith.cmpi ne, %1, %c0_i32_0 : i32
    scf.if %2 {
      %cst_10 = arith.constant 0.000000e+00 : f32
      %13 = vector.broadcast %cst_10 : f32 to vector<1x130xf32>
      %c0_11 = arith.constant 0 : index
      %c0_12 = arith.constant 0 : index
      %14 = vector.load %arg7[%c0_11, %c0_12] : memref<1x130xf32, #tpu.memory_space<vmem>>, vector<1x130xf32>
      tpu.vector_store %arg7[%c0_11, %c0_12], %13 {strides = array<i32>} : memref<1x130xf32, #tpu.memory_space<vmem>>, vector<1x130xf32>,
    } else {
    }
    %c0 = arith.constant 0 : index
    %c0_1 = arith.constant 0 : index
    %3 = vector.load %arg7[%c0, %c0_1] : memref<1x130xf32, #tpu.memory_space<vmem>>, vector<1x130xf32>
    %c0_2 = arith.constant 0 : index
    %c0_3 = arith.constant 0 : index
    %4 = vector.load %arg1[%c0_2, %c0_3] : memref<1x128xf32, #tpu.memory_space<vmem>>, vector<1x128xf32>
    %5 = arith.truncf %4 : vector<1x128xf32> to vector<1x128xbf16>
    %c0_4 = arith.constant 0 : index
    %c0_5 = arith.constant 0 : index
    %6 = vector.load %arg2[%c0_4, %c0_5] : memref<130x128xbf16, #tpu.memory_space<vmem>>, vector<130x128xbf16>
    %cst = arith.constant dense<0.000000e+00> : vector<1x130xf32>
    %7 = tpu.matmul %5, %6, %cst {dimension_numbers = #tpu.dot_dimension_numbers<[1], [1], [0], [0], [0, 0, 1, 0], [], []>} : vector<1x128xbf16>, vector<130x128xbf16>, vector<1x130xf32> -> vector<1x130xf32>
    %8 = arith.addf %3, %7 : vector<1x130xf32>
    %c0_6 = arith.constant 0 : index
    %c0_7 = arith.constant 0 : index
    %9 = vector.load %arg7[%c0_6, %c0_7] : memref<1x130xf32, #tpu.memory_space<vmem>>, vector<1x130xf32>
    tpu.vector_store %arg7[%c0_6, %c0_7], %8 {strides = array<i32>} : memref<1x130xf32, #tpu.memory_space<vmem>>, vector<1x130xf32>,
    %c0_i32_8 = arith.constant 0 : i32
    %10 = arith.cmpi eq, %arg0, %c0_i32_8 : i32
    %11 = arith.extui %10 : i1 to i32
    %c0_i32_9 = arith.constant 0 : i32
    %12 = arith.cmpi ne, %11, %c0_i32_9 : i32
    scf.if %12 {
      %c0_10 = arith.constant 0 : index
      %c0_11 = arith.constant 0 : index
      %13 = vector.load %arg7[%c0_10, %c0_11] : memref<1x130xf32, #tpu.memory_space<vmem>>, vector<1x130xf32>
      %c0_12 = arith.constant 0 : index
      %c0_13 = arith.constant 0 : index
      %14 = vector.load %arg3[%c0_12, %c0_13] : memref<1x130xf32, #tpu.memory_space<vmem>>, vector<1x130xf32>
      %15 = arith.addf %13, %14 : vector<1x130xf32>
      %cst_14 = arith.constant 0.000000e+00 : f32
      %16 = vector.broadcast %cst_14 : f32 to vector<1x130xf32>
      %17 = arith.maximumf %15, %16 : vector<1x130xf32>
      %18 = arith.truncf %17 : vector<1x130xf32> to vector<1x130xbf16>
      %c0_15 = arith.constant 0 : index
      %c0_16 = arith.constant 0 : index
      %19 = vector.load %arg4[%c0_15, %c0_16] : memref<75x130xbf16, #tpu.memory_space<vmem>>, vector<75x130xbf16>
      %cst_17 = arith.constant dense<0.000000e+00> : vector<1x75xf32>
      %20 = tpu.matmul %18, %19, %cst_17 {dimension_numbers = #tpu.dot_dimension_numbers<[1], [1], [0], [0], [0, 0, 1, 0], [], []>} : vector<1x130xbf16>, vector<75x130xbf16>, vector<1x75xf32> -> vector<1x75xf32>
      %c0_18 = arith.constant 0 : index
      %c0_19 = arith.constant 0 : index
      %21 = vector.load %arg5[%c0_18, %c0_19] : memref<1x75xf32, #tpu.memory_space<vmem>>, vector<1x75xf32>
      %22 = arith.addf %20, %21 : vector<1x75xf32>
      %cst_20 = arith.constant 0.000000e+00 : f32
      %23 = vector.broadcast %cst_20 : f32 to vector<1x75xf32>
      %24 = arith.maximumf %22, %23 : vector<1x75xf32>
      %c0_21 = arith.constant 0 : index
      %c0_22 = arith.constant 0 : index
      %25 = vector.load %arg6[%c0_21, %c0_22] : memref<1x75xf32, #tpu.memory_space<vmem>>, vector<1x75xf32>
      tpu.vector_store %arg6[%c0_21, %c0_22], %24 {strides = array<i32>} : memref<1x75xf32, #tpu.memory_space<vmem>>, vector<1x75xf32>,
    } else {
    }
    return
  }
  func.func @transform_0(%arg0: i32) -> (i32, i32) {
    %c0_i32 = arith.constant 0 : i32
    %c0_i32_0 = arith.constant 0 : i32
    return %c0_i32, %arg0 : i32, i32
  }
  func.func @transform_1(%arg0: i32) -> (i32, i32) {
    %c0_i32 = arith.constant 0 : i32
    %c0_i32_0 = arith.constant 0 : i32
    return %c0_i32, %arg0 : i32, i32
  }
  func.func @transform_2(%arg0: i32) -> (i32, i32) {
    %c0_i32 = arith.constant 0 : i32
    %c0_i32_0 = arith.constant 0 : i32
    %c0_i32_1 = arith.constant 0 : i32
    return %c0_i32, %c0_i32_0 : i32, i32
  }
  func.func @transform_3(%arg0: i32) -> (i32, i32) {
    %c0_i32 = arith.constant 0 : i32
    %c0_i32_0 = arith.constant 0 : i32
    %c0_i32_1 = arith.constant 0 : i32
    return %c0_i32, %c0_i32_0 : i32, i32
  }
  func.func @transform_4(%arg0: i32) -> (i32, i32) {
    %c0_i32 = arith.constant 0 : i32
    %c0_i32_0 = arith.constant 0 : i32
    %c0_i32_1 = arith.constant 0 : i32
    return %c0_i32, %c0_i32_0 : i32, i32
  }
  func.func @transform_5(%arg0: i32) -> (i32, i32) {
    %c0_i32 = arith.constant 0 : i32
    %c0_i32_0 = arith.constant 0 : i32
    %c0_i32_1 = arith.constant 0 : i32
    return %c0_i32, %c0_i32_0 : i32, i32
  }
}

module attributes {stable_mosaic.version = 11 : i64} {
  func.func @_layer2_kernel(%arg0: i32, %arg1: memref<1x75xf32, #tpu.memory_space<vmem>>, %arg2: memref<75x128xbf16, #tpu.memory_space<vmem>>, %arg3: memref<1x128xbf16, #tpu.memory_space<vmem>>, %arg4: memref<1x128xf32, #tpu.memory_space<vmem>>) attributes {dimension_semantics = [#tpu.dimension_semantics<parallel>], iteration_bounds = array<i64: 1>, scalar_prefetch = 0 : i64, scratch_operands = 0 : i64, tpu.core_type = #tpu.core_type<tc>, window_params = [{pipeline_mode = #tpu.pipeline_mode<synchronous>, transform_indices = @transform_0, window_bounds = array<i64: 1, 75>}, {transform_indices = @transform_1, window_bounds = array<i64: 75, 128>}, {transform_indices = @transform_2, window_bounds = array<i64: 1, 128>}, {transform_indices = @transform_3, window_bounds = array<i64: 1, 128>}]} {
    %c0 = arith.constant 0 : index
    %c0_0 = arith.constant 0 : index
    %0 = vector.load %arg1[%c0, %c0_0] : memref<1x75xf32, #tpu.memory_space<vmem>>, vector<1x75xf32>
    %1 = arith.truncf %0 : vector<1x75xf32> to vector<1x75xbf16>
    %c0_1 = arith.constant 0 : index
    %c0_2 = arith.constant 0 : index
    %2 = vector.load %arg2[%c0_1, %c0_2] : memref<75x128xbf16, #tpu.memory_space<vmem>>, vector<75x128xbf16>
    %cst = arith.constant dense<0.000000e+00> : vector<1x128xf32>
    %3 = tpu.matmul %1, %2, %cst {dimension_numbers = #tpu.dot_dimension_numbers<[1], [0], [0], [1], [0, 0, 1, 1], [], []>} : vector<1x75xbf16>, vector<75x128xbf16>, vector<1x128xf32> -> vector<1x128xf32>
    %c0_3 = arith.constant 0 : index
    %c0_4 = arith.constant 0 : index
    %4 = vector.load %arg3[%c0_3, %c0_4] : memref<1x128xbf16, #tpu.memory_space<vmem>>, vector<1x128xbf16>
    %5 = arith.extf %4 : vector<1x128xbf16> to vector<1x128xf32>
    %6 = arith.addf %3, %5 : vector<1x128xf32>
    %cst_5 = arith.constant 0.000000e+00 : f32
    %7 = vector.broadcast %cst_5 : f32 to vector<1x128xf32>
    %8 = arith.maximumf %6, %7 : vector<1x128xf32>
    %c0_6 = arith.constant 0 : index
    %c0_7 = arith.constant 0 : index
    %9 = vector.load %arg4[%c0_6, %c0_7] : memref<1x128xf32, #tpu.memory_space<vmem>>, vector<1x128xf32>
    tpu.vector_store %arg4[%c0_6, %c0_7], %8 {strides = array<i32>} : memref<1x128xf32, #tpu.memory_space<vmem>>, vector<1x128xf32>,
    return
  }
  func.func @transform_0(%arg0: i32) -> (i32, i32) {
    %c0_i32 = arith.constant 0 : i32
    %c0_i32_0 = arith.constant 0 : i32
    %c0_i32_1 = arith.constant 0 : i32
    return %c0_i32, %c0_i32_0 : i32, i32
  }
  func.func @transform_1(%arg0: i32) -> (i32, i32) {
    %c0_i32 = arith.constant 0 : i32
    %c0_i32_0 = arith.constant 0 : i32
    return %c0_i32, %arg0 : i32, i32
  }
  func.func @transform_2(%arg0: i32) -> (i32, i32) {
    %c0_i32 = arith.constant 0 : i32
    %c0_i32_0 = arith.constant 0 : i32
    return %c0_i32, %arg0 : i32, i32
  }
  func.func @transform_3(%arg0: i32) -> (i32, i32) {
    %c0_i32 = arith.constant 0 : i32
    %c0_i32_0 = arith.constant 0 : i32
    return %c0_i32, %arg0 : i32, i32
  }
}

</mosaic_0001>

<bundles_post_ra>
// kernel: squeeze.1
= control target key start
LH: loop header
LB: loop body
LE: loop exit
PB: predicated region body
PF: predicated region fallthrough
CT: control target
= control target key end

     0   :  { %s66_s8 = smov 116   ;;  %vm7_vm0 = vcmask 31744   ;;  %s67_s11 = smov 120   ;;  %s117_s0 = inlined_call_operand.vmem [shape: f32[32], index: 0, kind: input, shape index: {}]   ;;  %s118_s1 = inlined_call_operand.vmem [shape: f32[8,4], index: 1, kind: output, shape index: {}]  }
   0x1   :  { %v4_v0 = vld [vmem:[%s117_s0] sm:$0x1]  ;;  %s65_s0 = smov 124   ;;  %s68_s12 = smov 112  }
   0x2   :  { %5 = vst [vmem:[#allocation0] sm:$0x1] %v4_v0  ;;  %s69_s13 = smov 108   ;;  %s70_s14 = smov 104  }
   0x3   :  { %s71_s15 = smov 100  }
   0x9   :  { %v9_v1 = vld [vmem:[#allocation0] sm:$0x1]  }
   0xa   :  { %v21_v2 = vld [vmem:[#allocation0] sm:$0x1]   ;;  %10 = vrot.lane.b32.xlu0 %v9_v1, %s65_s0 }
   0xb   :  { %22 = vrot.lane.b32.xlu1 %v21_v2, %s66_s8  ;;  %v15_v3 = vld [vmem:[#allocation0] sm:$0x1]  }
   0xc   :  { %v27_v4 = vld [vmem:[#allocation0] sm:$0x1]  }
   0xd   :  { %v6_v5 = vld [vmem:[#allocation0] sm:$0x1]  }
   0xe   :  { %8 = vst.msk [vmem:[%s118_s1] sm:$0x1] %vm7_vm0, %v6_v5   ;;  %16 = vrot.lane.b32.xlu0 %v15_v3, %s67_s11  ;;  %v33_v6 = vld [vmem:[#allocation0] sm:$0x1]  }
   0xf   :  { %28 = vrot.lane.b32.xlu1 %v27_v4, %s68_s12  ;;  %v39_v7 = vld [vmem:[#allocation0] sm:$0x1]  }
  0x10   :  { %v45_v8 = vld [vmem:[#allocation0] sm:$0x1]  }
  0x12   :  { %34 = vrot.lane.b32.xlu0 %v33_v6, %s69_s13 }
  0x13   :  { %40 = vrot.lane.b32.xlu1 %v39_v7, %s70_s14 }
  0x16   :  { %46 = vrot.lane.b32.xlu0 %v45_v8, %s71_s15 }
  0x7c   :  { %v11_v9 = vpop.permute.xlu0 %10  }
  0x7d   :  { %v23_v10 = vpop.permute.xlu1 %22   ;;  %51 = vst.msk [vmem:[%s118_s1 + $0x1] sm:$0x1] %vm7_vm0, %v11_v9  }
  0x7e   :  { %53 = vst.msk [vmem:[%s118_s1 + $0x3] sm:$0x1] %vm7_vm0, %v23_v10  }
  0x80   :  { %v17_v11 = vpop.permute.xlu0 %16  }
  0x81   :  { %v29_v12 = vpop.permute.xlu1 %28   ;;  %52 = vst.msk [vmem:[%s118_s1 + $0x2] sm:$0x1] %vm7_vm0, %v17_v11  }
  0x82   :  { %54 = vst.msk [vmem:[%s118_s1 + $0x4] sm:$0x1] %vm7_vm0, %v29_v12  }
  0x84   :  { %v35_v13 = vpop.permute.xlu0 %34  }
  0x85   :  { %v41_v14 = vpop.permute.xlu1 %40   ;;  %55 = vst.msk [vmem:[%s118_s1 + $0x5] sm:$0x1] %vm7_vm0, %v35_v13  }
  0x86   :  { %56 = vst.msk [vmem:[%s118_s1 + $0x6] sm:$0x1] %vm7_vm0, %v41_v14  }
  0x88   :  { %v47_v15 = vpop.permute.xlu0 %46  }
  0x89   :  { %57 = vst.msk [vmem:[%s118_s1 + $0x7] sm:$0x1] %vm7_vm0, %v47_v15  }

// kernel: _aw_forward_impl.3
= control target key start
LH: loop header
LB: loop body
LE: loop exit
PB: predicated region body
PF: predicated region fallthrough
CT: control target
= control target key end

     0   :  { %v149_v0 = vmov 0.0   ;;  %vm150_vm0 = vmmov 0   ;;  %vm62_vm1 = vcmask 1044480   ;;  %vm63_vm2 = vcmask 1045504   ;;  %s196_s1 = inlined_call_operand.vmem [shape: bf16[75,128], index: 1, kind: input, shape index: {}]   ;;  %s197_s0 = inlined_call_operand.vmem [shape: f32[1,75], index: 0, kind: input, shape index: {}]   ;;  %s198_s2 = inlined_call_operand.vmem [shape: bf16[1,128], index: 2, kind: input, shape index: {}]   ;;  %s199_s3 = inlined_call_operand.vmem [shape: f32[1,128], index: 3, kind: output, shape index: {}]  }
   0x1   :  { %127 = vmatprep.subr.bf16.mxu0 %v149_v0  ;;  %v144_v1 = vld [vmem:[%s196_s1] sm:$0xff]   ;;  %v145_v2 = vld [vmem:[%s196_s1 + $0x8] sm:$0xff]   ;;  %137 = vmatprep.mubr.msk.bf16.mxu0 %vm150_vm0, %v149_v0  ;;  %v146_v3 = vld [vmem:[%s196_s1 + $0x10] sm:$0xff]   ;;  %v151_v4 = vmov 65535   ;;  %vm58_vm3 = vcmask 613376  }
   0x2   :  { %128 = vmatpush3.bf16.msra.mxu0 %v144_v1  ;;  %v64_v5 = vsel %vm62_vm1, 4294967295, %v151_v4  ;;  %v147_v6 = vld [vmem:[%s196_s1 + $0x18] sm:$0xff]   ;;  %v148_v7 = vld [vmem:[%s196_s1 + $0x20] sm:$0x3f]  }
   0x3   :  { %129 = vmatprep.subr.bf16.mxu0 %v149_v0  ;;  %v65_v8 = vsel %vm63_vm2, %v64_v5, 0  ;;  %v15_v10 = vld [vmem:[%s197_s0] sm:$0x1] }
   0x4   :  { %v67_v9 = vand.u32 %v148_v7, %v65_v8  ;;  %v16_v11 = vpack.c.bf16 %v15_v10, %v15_v10  ;;  %v27_v12 = vld [vmem:[%s198_s2] sm:$0x1] }
   0x5   :  { %v28_v13 = vunpack.c.l.bf16 %v27_v12 }
   0x6   :  { %130 = vmatpush3.bf16.msra.mxu0 %v145_v2 }
   0x7   :  { %131 = vmatprep.subr.bf16.mxu0 %v149_v0 }
   0xa   :  { %132 = vmatpush3.bf16.msra.mxu0 %v146_v3 }
   0xb   :  { %133 = vmatprep.subr.bf16.mxu0 %v149_v0 }
   0xe   :  { %134 = vmatpush3.bf16.msra.mxu0 %v147_v6 }
   0xf   :  { %135 = vmatprep.subr.bf16.mxu0 %v149_v0 }
  0x12   :  { %136 = vmatpush3.bf16.msra.mxu0 %v67_v9 }
  0x15   :  { %138 = vmatmul.mubr.msk.bf16.vlgmr.msra.gmra.mrb[0].mxu0 %vm58_vm3, %v16_v11 }
  0xe8   :  { %v103_v14 = vpop.f32.mrb[0].mxu0 }
  0xe9   :  { %v104_v15 = vadd.f32 %v103_v14, %v28_v13  ;;  %v139_v16 = vpop.f32.mrb[1].mxu0 }
  0xea   :  { %v106_v17 = vpop.f32.mrb[2].mxu0 }
  0xeb   :  { %v109_v18 = vmax.f32 %v104_v15, 0.0  ;;  %v140_v19 = vpop.f32.mrb[3].mxu0 }
  0xed   :  { %110 = vst [vmem:[%s199_s3] sm:$0x1] %v109_v18 }

// kernel: _aw_forward_impl.2
= control target key start
LH: loop header
LB: loop body
LE: loop exit
PB: predicated region body
PF: predicated region fallthrough
CT: control target
= control target key end

     0   :  { %v361_v0 = vmov 0   ;;  %vm243_vm0 = vcmask 15360   ;;  %v25_v16 = vlaneseq  ;;  %v362_v18 = vmov 0.0   ;;  %s477_s1 = inlined_call_operand.vmem [shape: bf16[130,128], index: 1, kind: input, shape index: {}]   ;;  %s478_s3 = inlined_call_operand.vmem [shape: bf16[75,130], index: 3, kind: input, shape index: {}]   ;;  %s479_s0 = inlined_call_operand.vmem [shape: f32[1,128], index: 0, kind: input, shape index: {}]   ;;  %s480_s2 = inlined_call_operand.vmem [shape: f32[1,130], index: 2, kind: input, shape index: {}]   ;;  %s481_s4 = inlined_call_operand.vmem [shape: f32[1,75], index: 4, kind: input, shape index: {}]   ;;  %s482_s5 = inlined_call_operand.vmem [shape: f32[1,75], index: 5, kind: output, shape index: {}]  }
   0x1   :  { %102 = vmatprep.subr.bf16.mxu0 %v361_v0  ;;  %v337_v1 = vld [vmem:[%s477_s1] sm:$0xff]   ;;  %134 = vmatprep.mubr.bf16.mxu0 %v361_v0  ;;  %v338_v2 = vld [vmem:[%s477_s1 + $0x8] sm:$0xff]   ;;  %v349_v5 = vld [vmem:[%s478_s3 + $0x14] ss:$8 sps:$4 sm:$0xff]   ;;  %v363_v25 = vmov 1966171168  }
   0x2   :  { %103 = vmatpush1.bf16.xpose.msra.mxu0 %v337_v1  ;;  %v346_v3 = vld [vmem:[%s478_s3 + $0x4] ss:$8 sps:$4 sm:$0xff]   ;;  %v348_v4 = vld [vmem:[%s478_s3] ss:$8 sps:$4 sm:$0xff]   ;;  %v339_v6 = vld [vmem:[%s477_s1 + $0x10] sm:$0xff]   ;;  %vm438_vm1 = vcmp.lt.s32.totalorder %v25_v16, 130  ;;  %v147_v26 = vunpack.c.l.s4 %v363_v25 }
   0x3   :  { %104 = vmatprep.subr.bf16.mxu0 %v361_v0  ;;  %328 = vmatprep.subr.msk.bf16.mxu1 %vm243_vm0, %v346_v3  ;;  %v351_v7 = vld [vmem:[%s478_s3 + $0x10] ss:$8 sps:$4 sm:$0xff]   ;;  %v341_v9 = vld [vmem:[%s477_s1 + $0x20] sm:$0xff]   ;;  %v342_v10 = vld [vmem:[%s477_s1 + $0x28] sm:$0xff]   ;;  %29 = vst.msk [vmem:[#allocation2] sm:$0x3] %vm438_vm1, %v362_v18 }
   0x4   :  { %263 = vmatpush1.bf16.xpose.msra.mxu1 %v348_v4  ;;  %v340_v8 = vld [vmem:[%s477_s1 + $0x18] sm:$0xff]   ;;  %v343_v11 = vld [vmem:[%s477_s1 + $0x30] sm:$0xff]   ;;  %v345_v13 = vld [vmem:[%s477_s1 + $0x40] ss:$0 sps:$4 sm:$0x11]   ;;  %v148_v27 = vunpack.c.0.s8 %v147_v26  ;;  %v150_v28 = vshrl.u32 %v25_v16, 7 }
   0x5   :  { %329 = vmatprep.subr.msk.bf16.mxu1 %vm243_vm0, %v349_v5  ;;  %v344_v12 = vld [vmem:[%s477_s1 + $0x38] sm:$0xff]   ;;  %v31_v14 = vld [vmem:[%s479_s0] sm:$0x1]  ;;  %v352_v19 = vld [vmem:[%s478_s3 + $0x24] ss:$8 sps:$4 sm:$0xff]   ;;  %vm303_vm2 = vcmask 606208  }
   0x6   :  { %v32_v15 = vpack.c.bf16 %v31_v14, %v31_v14  ;;  %v354_v20 = vld [vmem:[%s478_s3 + $0x20] ss:$8 sps:$4 sm:$0xff]   ;;  %v355_v21 = vld [vmem:[%s478_s3 + $0x34] ss:$8 sps:$4 sm:$0xff]   ;;  %v357_v22 = vld [vmem:[%s478_s3 + $0x30] ss:$8 sps:$4 sm:$0xff]   ;;  %v151_v30 = vsub.s32 %v148_v27, %v150_v28 }
   0x7   :  { %v358_v23 = vld [vmem:[%s478_s3 + $0x44] ss:$8 sps:$4 sm:$0x3f]   ;;  %v360_v24 = vld [vmem:[%s478_s3 + $0x40] ss:$8 sps:$4 sm:$0x3f]  }
   0x8   :  { %v171_v39 = vld [vmem:[%s480_s2] sm:$0x3]  ;;  %v181_v42 = vsub.s32 1, %v150_v28  ;;  %v177_v43 = vsub.s32 0, %v150_v28 }
   0x9   :  { %v197_v49 = vld [vmem:[%s481_s4] sm:$0x1] }
   0xa   :  { %105 = vmatpush1.bf16.xpose.msra.mxu0 %v338_v2  ;;  %v30_v36 = vld [vmem:[#allocation2] sm:$0x3] }
   0xb   :  { %106 = vmatprep.subr.bf16.mxu0 %v361_v0 }
   0xc   :  { %265 = vmatpush1.bf16.xpose.msra.mxu1 %v351_v7 }
   0xd   :  { %330 = vmatprep.subr.msk.bf16.mxu1 %vm243_vm0, %v352_v19 }
  0x12   :  { %107 = vmatpush1.bf16.xpose.msra.mxu0 %v339_v6 }
  0x13   :  { %108 = vmatprep.subr.bf16.mxu0 %v361_v0 }
  0x14   :  { %267 = vmatpush1.bf16.xpose.msra.mxu1 %v354_v20 }
  0x15   :  { %331 = vmatprep.subr.msk.bf16.mxu1 %vm243_vm0, %v355_v21 }
  0x1a   :  { %109 = vmatpush1.bf16.xpose.msra.mxu0 %v340_v8 }
  0x1b   :  { %110 = vmatprep.subr.bf16.mxu0 %v361_v0 }
  0x1c   :  { %269 = vmatpush1.bf16.xpose.msra.mxu1 %v357_v22 }
  0x1d   :  { %332 = vmatprep.subr.msk.bf16.mxu1 %vm243_vm0, %v358_v23 }
  0x22   :  { %111 = vmatpush1.bf16.xpose.msra.mxu0 %v341_v9 }
  0x23   :  { %112 = vmatprep.subr.bf16.mxu0 %v361_v0 }
  0x24   :  { %271 = vmatpush1.bf16.xpose.msra.mxu1 %v360_v24 }
  0x2a   :  { %113 = vmatpush1.bf16.xpose.msra.mxu0 %v342_v10 }
  0x2b   :  { %114 = vmatprep.subr.bf16.mxu0 %v361_v0 }
  0x32   :  { %115 = vmatpush1.bf16.xpose.msra.mxu0 %v343_v11 }
  0x33   :  { %116 = vmatprep.subr.bf16.mxu0 %v361_v0 }
  0x3a   :  { %117 = vmatpush1.bf16.xpose.msra.mxu0 %v344_v12 }
  0x3b   :  { %118 = vmatprep.subr.bf16.mxu0 %v361_v0 }
  0x42   :  { %119 = vmatpush1.bf16.xpose.msra.mxu0 %v345_v13 }
  0x49   :  { %135 = vmatmul.mubr.bf16.vlgmr.msra.gmra.mrb[0].mxu0 %v32_v15 }
 0x11c   :  { %v136_v29 = vpop.f32.mrb[0].mxu0 }
 0x11d   :  { %v138_v31 = vpop.f32.mrb[1].mxu0 }
 0x11e   :  { %v145_v32 = vcombine.low %v136_v29, %v138_v31  ;;  %v140_v33 = vpop.f32.mrb[2].mxu0 }
 0x11f   :  { %v141_v34 = vpop.f32.mrb[3].mxu0 }
 0x120   :  { %v152_v35 = vrot.slane %v145_v32, %v151_v30 }
 0x122   :  { %v159_v37 = vrot.slane %v152_v35, %v151_v30 }
 0x124   :  { %v161_v38 = vadd.f32 %v159_v37, %v30_v36 }
 0x126   :  { %166 = vst.msk [vmem:[#allocation2] sm:$0x3] %vm438_vm1, %v161_v38 }
 0x12d   :  { %v170_v40 = vld [vmem:[#allocation2] sm:$0x3] }
 0x12e   :  { %v172_v41 = vadd.f32 %v171_v39, %v170_v40 }
 0x130   :  { %v173_v44 = vmax.f32 %v172_v41, 0.0 }
 0x132   :  { %v182_v45 = vrot.slane %v173_v44, %v181_v42  ;;  %v178_v46 = vrot.slane %v173_v44, %v177_v43 }
 0x134   :  { %v186_v47 = vpack.c.bf16 %v182_v45, %v182_v45  ;;  %v185_v48 = vpack.c.bf16 %v178_v46, %v178_v46 }
 0x136   :  { %333 = vmatprep.mubr.msk.bf16.mxu1 %vm243_vm0, %v186_v47 }
 0x137   :  { %295 = vmatmul.mubr.bf16.vlgmr.msra.gmra.mrb[0].mxu1 %v185_v48 }
 0x20a   :  { %v296_v50 = vpop.f32.mrb[0].mxu1 }
 0x20b   :  { %v297_v51 = vadd.f32 %v296_v50, %v197_v49  ;;  %v298_v52 = vpop.f32.mrb[1].mxu1 }
 0x20c   :  { %v299_v53 = vpop.f32.mrb[2].mxu1 }
 0x20d   :  { %v302_v54 = vmax.f32 %v297_v51, 0.0  ;;  %v300_v55 = vpop.f32.mrb[3].mxu1 }
 0x20f   :  { %304 = vst.msk [vmem:[%s482_s5] sm:$0x1] %vm303_vm2, %v302_v54 }

</bundles_post_ra>
